<compile_context>
chip_gen: v5e
topology: v5e:2x2
jax: 0.10.0
libtpu: 0.0.40
codegen_flags: <defaults>
</compile_context>

<pallas_src>
import functools

import jax
import jax.numpy as jnp
from jax.experimental import pallas as pl
from jax.experimental.pallas import tpu as pltpu


def _round_up(a: int, b: int) -> int:
    return (a + b - 1) // b * b


def _cdiv(a: int, b: int) -> int:
    return (a + b - 1) // b


_VMEM_BUDGET = 48 * 1024 * 1024   # per-kernel working-set target (< v7x 64 MiB physical)
_VMEM_LIMIT = 64 * 1024 * 1024    # scoped VMEM limit handed to Mosaic
_NUM_SPLITS = 2                   # leading "parallel" axis (v7x has 2 TensorCores)


def _fit_tile(rows_needed: int, per_row_bytes: int, fixed_bytes: int, cap: int) -> int:
    """Largest multiple-of-8 row tile that fits the VMEM budget (>= 8)."""
    avail = max(_VMEM_BUDGET - fixed_bytes, 8 * per_row_bytes)
    t = min(int(cap), int(avail // per_row_bytes), _round_up(max(rows_needed, 1), 8))
    return max(8, (t // 8) * 8)


def _divisor_tile(n_pad: int, cap: int) -> int:
    """Largest multiple-of-8 divisor of n_pad that is <= cap (n_pad is a multiple of 8)."""
    cap = max(8, min(int(cap), n_pad))
    cap -= cap % 8
    for t in range(cap, 7, -8):
        if n_pad % t == 0:
            return t
    return 8


# ---------------------------------------------------------------------------
# Pass 1: per-metapath score sums  sum_n  w2 . tanh(W1^T z[n, m] + b1)
# ---------------------------------------------------------------------------
def _scores_kernel(z2_ref, w1_ref, b1_ref, w2_ref, acc_ref, *,
                   mxu_dtype, tanh_dtype, pad_rows):
    c = pl.program_id(0)          # split (core) index
    i = pl.program_id(1)          # N-tile index inside this split

    @pl.when(i == 0)
    def _():
        acc_ref[...] = jnp.zeros_like(acc_ref)

    # Matmul operands in `mxu_dtype` (bf16 fast path); f32 accumulation on the MXU.
    x = z2_ref[...].astype(mxu_dtype)                                  # (tile, M*D)
    pre = jnp.dot(x, w1_ref[...], preferred_element_type=jnp.float32) + b1_ref[...]
    h = jnp.tanh(pre.astype(tanh_dtype))                               # EUP (bf16 on v6e/v7x)
    contrib = h.astype(jnp.float32) * w2_ref[...]                      # (tile, M*H) f32

    acc_ref[0] += jnp.sum(contrib, axis=0, keepdims=True)              # (1, M*H)

    if pad_rows:
        # Padded (all-zero) rows contribute exactly tanh(b1)*w2 each; subtract
        # their total once, with the SAME in-kernel ops, so the mean is unbiased.
        @pl.when((c == pl.num_programs(0) - 1) & (i == pl.num_programs(1) - 1))
        def _():
            corr = jnp.tanh(b1_ref[...].astype(tanh_dtype)).astype(jnp.float32) * w2_ref[...]
            acc_ref[0] -= jnp.float32(pad_rows) * corr


# ---------------------------------------------------------------------------
# Pass 2: out[n, :] = sum_m beta[m] * z[n, m, :]  (beta applied in f32)
# ---------------------------------------------------------------------------
def _weighted_sum_kernel(z2_ref, bmat_ref, out_ref):
    out_ref[...] = jnp.dot(
        z2_ref[...], bmat_ref[...], preferred_element_type=jnp.float32
    ).astype(out_ref.dtype)


def semantic_attention(z, w1, b1, w2_row, *, tile_n=1024, tile_n_pass2=None,
                       score_dtype=jnp.bfloat16):
    """z: (N, M, D); w1: (D, H); b1: (1, H); w2_row: (1, H) (= Linear(H,1).weight).

    `score_dtype` controls the pass-1 projection matmul / tanh dtype (accumulation
    is always f32).  bf16 (default) keeps pass 1 memory-bound on all generations;
    pass jnp.float32 for exact f32 parity with the PyTorch reference.
    """
    N, M, D = z.shape
    H = w1.shape[1]
    zdt = z.dtype
    z_bytes = jnp.dtype(zdt).itemsize
    mxu_dtype = jnp.dtype(score_dtype)
    tanh_dtype = mxu_dtype

    # ---- pass-1 tile derived from a real VMEM budget (not just a limit clamp) ----
    per_row1 = (M * D) * (2 * z_bytes + mxu_dtype.itemsize) + (M * H) * (3 * 4 + 2)
    fixed1 = (M * D) * (M * H) * mxu_dtype.itemsize + 4 * (M * H) * 4
    tile1 = _fit_tile(_cdiv(N, _NUM_SPLITS), per_row1, fixed1, tile_n)

    n_pad = _round_up(N, _NUM_SPLITS * tile1)
    inner = n_pad // (_NUM_SPLITS * tile1)
    pad_rows = n_pad - N

    # ---- wrapper-side layout plumbing (free) ----
    z2 = z.reshape(N, M * D)
    if pad_rows:
        z2 = jnp.pad(z2, ((0, pad_rows), (0, 0)))     # zero rows, corrected in-kernel

    # Block-diagonal W1 (M*D, M*H) in the matmul dtype; f32 lane-tiled b1 / w2.
    w1_big = jnp.kron(jnp.eye(M, dtype=jnp.float32),
                      w1.astype(jnp.float32)).astype(mxu_dtype)
    b1_t = jnp.tile(b1.astype(jnp.float32), (1, M))      # (1, M*H)
    w2_t = jnp.tile(w2_row.astype(jnp.float32), (1, M))  # (1, M*H)

    # ------------------------- pass 1: score sums -------------------------
    partials = pl.pallas_call(
        functools.partial(_scores_kernel, mxu_dtype=mxu_dtype,
                          tanh_dtype=tanh_dtype, pad_rows=pad_rows),
        out_shape=jax.ShapeDtypeStruct((_NUM_SPLITS, 1, M * H), jnp.float32),
        grid_spec=pltpu.PrefetchScalarGridSpec(
            num_scalar_prefetch=0,
            grid=(_NUM_SPLITS, inner),
            in_specs=[
                pl.BlockSpec((tile1, M * D), lambda c, i: (c * inner + i, 0)),
                pl.BlockSpec((M * D, M * H), lambda c, i: (0, 0)),
                pl.BlockSpec((1, M * H), lambda c, i: (0, 0)),
                pl.BlockSpec((1, M * H), lambda c, i: (0, 0)),
            ],
            out_specs=pl.BlockSpec((1, 1, M * H), lambda c, i: (c, 0, 0)),
        ),
        compiler_params=pltpu.CompilerParams(
            dimension_semantics=("parallel", "arbitrary"),   # split across TCs on v7x
            vmem_limit_bytes=_VMEM_LIMIT,
        ),
    )(z2, w1_big, b1_t, w2_t)

    # --- tiny (M,)-sized global mean + sigmoid in plain JAX ---
    score_sum = partials.sum(axis=(0, 1)).reshape(M, H).sum(axis=1)   # (M,)
    beta = jax.nn.sigmoid(score_sum / jnp.float32(N))                 # (M,) f32

    # Stacked beta-scaled identities (M*D, D), beta kept in f32 (exact weighting).
    bmat = (beta[:, None, None] * jnp.eye(D, dtype=jnp.float32)[None]).reshape(M * D, D)

    # ------------------------- pass 2: weighted sum -------------------------
    per_row2 = (M * D) * 2 * z_bytes + D * (2 * z_bytes + 4)
    fixed2 = (M * D) * D * 4
    cap2 = tile_n_pass2 if tile_n_pass2 is not None else 4096
    tile2 = _divisor_tile(n_pad, _fit_tile(n_pad, per_row2, fixed2, cap2))

    out_pad = pl.pallas_call(
        _weighted_sum_kernel,
        out_shape=jax.ShapeDtypeStruct((n_pad, D), zdt),     # unpadded lane width
        grid_spec=pltpu.PrefetchScalarGridSpec(
            num_scalar_prefetch=0,
            grid=(n_pad // tile2,),
            in_specs=[
                pl.BlockSpec((tile2, M * D), lambda i: (i, 0)),
                pl.BlockSpec((M * D, D), lambda i: (0, 0)),
            ],
            out_specs=pl.BlockSpec((tile2, D), lambda i: (i, 0)),
        ),
        compiler_params=pltpu.CompilerParams(
            dimension_semantics=("parallel",),               # independent N tiles
            vmem_limit_bytes=_VMEM_LIMIT,
        ),
    )(z2, bmat)

    return out_pad if pad_rows == 0 else out_pad[:N]


def semantic_attention_ref(z, w1, b1, w2_row):
    """Pure-JAX reference mirroring the PyTorch forward."""
    s = jnp.tanh(jnp.einsum("nmd,dh->nmh", z, w1) + b1[0])   # (N, M, H)
    proj = jnp.einsum("nmh,h->nm", s, w2_row[0])[..., None]  # (N, M, 1)
    w = proj.mean(0)                                         # (M, 1)
    beta = jax.nn.sigmoid(w)                                 # (M, 1)
    return (beta[None, :, :] * z).sum(1)                     # (N, D)


if __name__ == "__main__":
    # Small, shape-consistent example: N nodes, M metapaths, in_size D, hidden H.
    N, M, D, H = 50, 4, 32, 128

    key = jax.random.PRNGKey(0)
    kz, kw1, kb1, kw2 = jax.random.split(key, 4)

    z = jax.random.normal(kz, (N, M, D), dtype=jnp.float32)

    # Deterministic parameter init (synthetic; the module __init__ only defines shapes).
    w1 = jax.random.normal(kw1, (D, H), dtype=jnp.float32) * (1.0 / jnp.sqrt(D))
    b1 = jax.random.normal(kb1, (1, H), dtype=jnp.float32) * 0.01
    w2_row = jax.random.normal(kw2, (1, H), dtype=jnp.float32) * (1.0 / jnp.sqrt(H))

    ref = semantic_attention_ref(z, w1, b1, w2_row)

    # Exact f32 scoring path, small tiles: exercises multi-step accumulation on
    # both splits, row padding + the in-kernel analytic correction, and a
    # multi-tile pass 2.  Tight tolerance.
    out = jax.block_until_ready(
        semantic_attention(z, w1, b1, w2_row, tile_n=16, tile_n_pass2=16,
                           score_dtype=jnp.float32))
    assert out.shape == (N, D)
    assert jnp.allclose(out, ref, atol=1e-4, rtol=1e-4), "mismatch vs reference (f32 path)"

    # Default fast path (bf16 projection matmul + tanh, f32 accumulation/beta):
    # loose tolerance because the score projection is intentionally bf16.
    out2 = jax.block_until_ready(semantic_attention(z, w1, b1, w2_row))
    assert out2.shape == (N, D)
    assert jnp.allclose(out2, ref, atol=1e-2, rtol=1e-2), "mismatch vs reference (bf16 path)"

    print("KERNEL_OK")
</pallas_src>

<mosaic_0001>
module attributes {stable_mosaic.version = 11 : i64} {
  func.func @_scores_kernel(%arg0: i32, %arg1: i32, %arg2: memref<16x128xf32, #tpu.memory_space<vmem>>, %arg3: memref<128x512xf32, #tpu.memory_space<vmem>>, %arg4: memref<1x512xf32, #tpu.memory_space<vmem>>, %arg5: memref<1x512xf32, #tpu.memory_space<vmem>>, %arg6: memref<1x1x512xf32, #tpu.memory_space<vmem>>) attributes {dimension_semantics = [#tpu.dimension_semantics<parallel>, #tpu.dimension_semantics<arbitrary>], iteration_bounds = array<i64: 2, 2>, scalar_prefetch = 0 : i64, scratch_operands = 0 : i64, tpu.core_type = #tpu.core_type<tc>, window_params = [{transform_indices = @transform_0, window_bounds = array<i64: 16, 128>}, {pipeline_mode = #tpu.pipeline_mode<synchronous>, transform_indices = @transform_1, window_bounds = array<i64: 128, 512>}, {pipeline_mode = #tpu.pipeline_mode<synchronous>, transform_indices = @transform_2, window_bounds = array<i64: 1, 512>}, {pipeline_mode = #tpu.pipeline_mode<synchronous>, transform_indices = @transform_3, window_bounds = array<i64: 1, 512>}, {transform_indices = @transform_4, window_bounds = array<i64: 1, 1, 512>}]} {
    %c0_i32 = arith.constant 0 : i32
    %0 = arith.cmpi eq, %arg1, %c0_i32 : i32
    %1 = arith.extui %0 : i1 to i32
    %c0_i32_0 = arith.constant 0 : i32
    %2 = arith.cmpi ne, %1, %c0_i32_0 : i32
    scf.if %2 {
      %cst_17 = arith.constant 0.000000e+00 : f32
      %26 = vector.broadcast %cst_17 : f32 to vector<1x1x512xf32>
      %c0_18 = arith.constant 0 : index
      %c0_19 = arith.constant 0 : index
      %c0_20 = arith.constant 0 : index
      %27 = vector.load %arg6[%c0_18, %c0_19, %c0_20] : memref<1x1x512xf32, #tpu.memory_space<vmem>>, vector<1x1x512xf32>
      tpu.vector_store %arg6[%c0_18, %c0_19, %c0_20], %26 {strides = array<i32>} : memref<1x1x512xf32, #tpu.memory_space<vmem>>, vector<1x1x512xf32>,
    } else {
    }
    %c0 = arith.constant 0 : index
    %c0_1 = arith.constant 0 : index
    %3 = vector.load %arg2[%c0, %c0_1] : memref<16x128xf32, #tpu.memory_space<vmem>>, vector<16x128xf32>
    %c0_2 = arith.constant 0 : index
    %c0_3 = arith.constant 0 : index
    %4 = vector.load %arg3[%c0_2, %c0_3] : memref<128x512xf32, #tpu.memory_space<vmem>>, vector<128x512xf32>
    %cst = arith.constant dense<0.000000e+00> : vector<16x512xf32>
    %5 = tpu.matmul %3, %4, %cst {dimension_numbers = #tpu.dot_dimension_numbers<[1], [0], [0], [1], [0, 0, 1, 1], [], []>} : vector<16x128xf32>, vector<128x512xf32>, vector<16x512xf32> -> vector<16x512xf32>
    %c0_4 = arith.constant 0 : index
    %c0_5 = arith.constant 0 : index
    %6 = vector.load %arg4[%c0_4, %c0_5] : memref<1x512xf32, #tpu.memory_space<vmem>>, vector<1x512xf32>
    %7 = vector.broadcast %6 : vector<1x512xf32> to vector<16x512xf32>
    %8 = arith.addf %5, %7 : vector<16x512xf32>
    %9 = math.tanh %8 : vector<16x512xf32>
    %c0_6 = arith.constant 0 : index
    %c0_7 = arith.constant 0 : index
    %10 = vector.load %arg5[%c0_6, %c0_7] : memref<1x512xf32, #tpu.memory_space<vmem>>, vector<1x512xf32>
    %11 = vector.broadcast %10 : vector<1x512xf32> to vector<16x512xf32>
    %12 = arith.mulf %9, %11 : vector<16x512xf32>
    %c0_8 = arith.constant 0 : index
    %c0_9 = arith.constant 0 : index
    %c0_10 = arith.constant 0 : index
    %13 = vector.load %arg6[%c0_8, %c0_9, %c0_10] : memref<1x1x512xf32, #tpu.memory_space<vmem>>, vector<1x1x512xf32>
    %14 = vector.shape_cast %13 : vector<1x1x512xf32> to vector<1x512xf32>
    %cst_11 = arith.constant dense<0.000000e+00> : vector<512xf32>
    %15 = vector.multi_reduction <add>, %12, %cst_11 [0] : vector<16x512xf32> to vector<512xf32>
    %16 = vector.shape_cast %15 : vector<512xf32> to vector<1x512xf32>
    %17 = arith.addf %14, %16 : vector<1x512xf32>
    %c0_12 = arith.constant 0 : index
    %c0_13 = arith.constant 0 : index
    %c0_14 = arith.constant 0 : index
    %18 = vector.load %arg6[%c0_12, %c0_13, %c0_14] : memref<1x1x512xf32, #tpu.memory_space<vmem>>, vector<1x1x512xf32>
    %19 = vector.shape_cast %18 : vector<1x1x512xf32> to vector<1x512xf32>
    %20 = vector.shape_cast %17 : vector<1x512xf32> to vector<1x1x512xf32>
    tpu.vector_store %arg6[%c0_12, %c0_13, %c0_14], %20 {strides = array<i32>} : memref<1x1x512xf32, #tpu.memory_space<vmem>>, vector<1x1x512xf32>,
    %c1_i32 = arith.constant 1 : i32
    %21 = arith.cmpi eq, %arg0, %c1_i32 : i32
    %c1_i32_15 = arith.constant 1 : i32
    %22 = arith.cmpi eq, %arg1, %c1_i32_15 : i32
    %23 = arith.andi %21, %22 : i1
    %24 = arith.extui %23 : i1 to i32
    %c0_i32_16 = arith.constant 0 : i32
    %25 = arith.cmpi ne, %24, %c0_i32_16 : i32
    scf.if %25 {
      %c0_17 = arith.constant 0 : index
      %c0_18 = arith.constant 0 : index
      %26 = vector.load %arg4[%c0_17, %c0_18] : memref<1x512xf32, #tpu.memory_space<vmem>>, vector<1x512xf32>
      %27 = math.tanh %26 : vector<1x512xf32>
      %c0_19 = arith.constant 0 : index
      %c0_20 = arith.constant 0 : index
      %28 = vector.load %arg5[%c0_19, %c0_20] : memref<1x512xf32, #tpu.memory_space<vmem>>, vector<1x512xf32>
      %29 = arith.mulf %27, %28 : vector<1x512xf32>
      %c0_21 = arith.constant 0 : index
      %c0_22 = arith.constant 0 : index
      %c0_23 = arith.constant 0 : index
      %30 = vector.load %arg6[%c0_21, %c0_22, %c0_23] : memref<1x1x512xf32, #tpu.memory_space<vmem>>, vector<1x1x512xf32>
      %31 = vector.shape_cast %30 : vector<1x1x512xf32> to vector<1x512xf32>
      %cst_24 = arith.constant 1.400000e+01 : f32
      %32 = vector.broadcast %cst_24 : f32 to vector<1x512xf32>
      %33 = arith.mulf %32, %29 : vector<1x512xf32>
      %34 = arith.subf %31, %33 : vector<1x512xf32>
      %c0_25 = arith.constant 0 : index
      %c0_26 = arith.constant 0 : index
      %c0_27 = arith.constant 0 : index
      %35 = vector.load %arg6[%c0_25, %c0_26, %c0_27] : memref<1x1x512xf32, #tpu.memory_space<vmem>>, vector<1x1x512xf32>
      %36 = vector.shape_cast %35 : vector<1x1x512xf32> to vector<1x512xf32>
      %37 = vector.shape_cast %34 : vector<1x512xf32> to vector<1x1x512xf32>
      tpu.vector_store %arg6[%c0_25, %c0_26, %c0_27], %37 {strides = array<i32>} : memref<1x1x512xf32, #tpu.memory_space<vmem>>, vector<1x1x512xf32>,
    } else {
    }
    return
  }
  func.func @transform_0(%arg0: i32, %arg1: i32) -> (i32, i32) {
    %c2_i32 = arith.constant 2 : i32
    %0 = arith.muli %arg0, %c2_i32 : i32
    %1 = arith.addi %0, %arg1 : i32
    %c0_i32 = arith.constant 0 : i32
    %c0_i32_0 = arith.constant 0 : i32
    return %1, %c0_i32 : i32, i32
  }
  func.func @transform_1(%arg0: i32, %arg1: i32) -> (i32, i32) {
    %c0_i32 = arith.constant 0 : i32
    %c0_i32_0 = arith.constant 0 : i32
    %c0_i32_1 = arith.constant 0 : i32
    return %c0_i32, %c0_i32_0 : i32, i32
  }
  func.func @transform_2(%arg0: i32, %arg1: i32) -> (i32, i32) {
    %c0_i32 = arith.constant 0 : i32
    %c0_i32_0 = arith.constant 0 : i32
    %c0_i32_1 = arith.constant 0 : i32
    return %c0_i32, %c0_i32_0 : i32, i32
  }
  func.func @transform_3(%arg0: i32, %arg1: i32) -> (i32, i32) {
    %c0_i32 = arith.constant 0 : i32
    %c0_i32_0 = arith.constant 0 : i32
    %c0_i32_1 = arith.constant 0 : i32
    return %c0_i32, %c0_i32_0 : i32, i32
  }
  func.func @transform_4(%arg0: i32, %arg1: i32) -> (i32, i32, i32) {
    %c0_i32 = arith.constant 0 : i32
    %c0_i32_0 = arith.constant 0 : i32
    %c0_i32_1 = arith.constant 0 : i32
    return %arg0, %c0_i32, %c0_i32_0 : i32, i32, i32
  }
}

</mosaic_0001>

<bundles_post_ra>
// kernel: tpu_custom_call.1
= control target key start
LH: loop header
LB: loop body
LE: loop exit
PB: predicated region body
PF: predicated region fallthrough
CT: control target
= control target key end

     0   :  { %s1384_s0 = inlined_call_operand.hbm [shape: f32[64,128], index: 0, kind: input, shape index: {}]   ;;  %s1385_s1 = inlined_call_operand.hbm [shape: f32[128,512], index: 1, kind: input, shape index: {}]   ;;  %s1386_s2 = inlined_call_operand.hbm [shape: f32[1,512], index: 2, kind: input, shape index: {}]   ;;  %s1387_s3 = inlined_call_operand.hbm [shape: f32[1,512], index: 3, kind: input, shape index: {}]   ;;  %s1388_s4 = inlined_call_operand.hbm [shape: f32[2,1,512], index: 4, kind: output, shape index: {}]  }
   0x1   :  { %1395 = sst [smem:[#allocation21_spill]] %s1385_s1 }
   0x2   :  { %1396 = sst [smem:[#allocation22_spill]] %s1386_s2 }
   0x3   :  { %1397 = sst [smem:[#allocation23_spill]] %s1387_s3 }
   0x4   :  { %1398 = sst [smem:[#allocation24_spill]] %s1388_s4 }
   0x5   :  { %9 = vsyncpa [#allocation3], 0 }
   0x6   :  { %11 = vsyncpa [#allocation3 + $0x1], 0 }
   0x7   :  { %12 = vsyncpa [#allocation6], 0 }
   0x8   :  { %13 = vsyncpa [#allocation9], 0 }
   0x9   :  { %14 = vsyncpa [#allocation4], 0 }
   0xa   :  { %16 = vsyncpa [#allocation4 + $0x1], 0  ;;  %s1145_s15 = smov 0   ;;  %s1147_s16 = smov 0  }
   0xb   :  { %s1149_s17 = smov 0   ;;  %s1151_s18 = smov 0  }
   0xc   :  { %s1153_s19 = smov 0   ;;  %s1155_s20 = smov 0  }
   0xd   :  { %s1157_s21 = smov 0   ;;  %s1159_s22 = smov 0  }
   0xe   :  { %s1161_s23 = smov 0   ;;  %s1163_s24 = smov 0  }
   0xf   :  { %s1165_s25 = smov 0  }
  0x10 LB: > { %1399 = sst [smem:[#allocation15_spill]] %s1070_s15  ;;  %s679_s26 = sadd.s32 4294967295, %s1110_s25   ;;  %s1110_s25 = sphi %s1165_s25, %s22_s25   ;;  %s1106_s24 = sphi %s1163_s24, %s1433_s24   ;;  %s1102_s23 = sphi %s1161_s23, %s1432_s23   ;;  %s1098_s22 = sphi %s1159_s22, %s1431_s22   ;;  %s1094_s21 = sphi %s1157_s21, %s1424_s21   ;;  %s1090_s20 = sphi %s1155_s20, %s1430_s20   ;;  %s1086_s19 = sphi %s1153_s19, %s1429_s19   ;;  %s1082_s18 = sphi %s1151_s18, %s1428_s18   ;;  %s1078_s17 = sphi %s1149_s17, %s1427_s17   ;;  %s1074_s16 = sphi %s1147_s16, %s1426_s16   ;;  %s1070_s15 = sphi %s1145_s15, %s1425_s15  }
  0x11   : > { %1400 = sst [smem:[#allocation16_spill]] %s1094_s21  ;;  %s680_s27 = sadd.s32 4294967294, %s1110_s25  }
  0x12   : > { %1401 = sst [smem:[#allocation17_spill]] %s1098_s22  ;;  %p58_p0 = scmp.ne.s32.totalorder %s1086_s19, %s1082_s18 }
  0x13   : > { %1402 = sst [smem:[#allocation18_spill]] %s1102_s23  ;;  %p1201_p1 = scmp.eq.s32.totalorder %s679_s26, 0 }
  0x14   : > { %p144_p2 = scmp.ne.s32.totalorder %s1078_s17, %s1074_s16  ;;  %p145_p3 = scmp.eq.s32.totalorder %s679_s26, 3 }
  0x15   : > { %p1209_p4 = por %p1201_p1, %p58_p0  ;;  %p150_p5 = scmp.ne.s32.totalorder %s1074_s16, %s1070_s15 }
  0x16   : > { %p1215_p6 = por %p145_p3, %p144_p2  ;;  %p151_p7 = scmp.eq.s32.totalorder %s680_s27, 3 }
  0x17   : > { %p683_p8 = scmp.ge.s32.totalorder %s1110_s25, 1  ;;  %p158_p9 = scmp.lt.s32.totalorder %s1110_s25, 5 }
  0x18   : > { %s1405_s30 = scalar_select %p1215_p6, 1, 0 }
  0x19   : > { %p1221_p10 = por %p151_p7, %p150_p5  ;;  %p1225_p11 = pnand %p683_p8, %p158_p9 }
  0x1a   : > { %1406 = sst [smem:[#allocation19_spill]] %s1405_s30  ;;  %s1112_s10 = smov [#allocation5]  }
  0x1b   : > { %s1407_s5 = scalar_select %p1221_p10, 1, 0 }
  0x1c   : > { %s1410_s1 = sld [smem:[#allocation21_spill]]  ;;  %p720_p12 = pneg %p1225_p11 }
  0x1d   : > { %1408 = sst [smem:[#allocation20_spill]] %s1407_s5  ;;  %s171_s11 = sshll.u32 %s1112_s10, 4  ;;  %s172_s11 = int_to_ptr.vmem [resolvable:$true] %s171_s11 }
  0x1e   : > { %p1236_p13 = pnand %p720_p12, %p1201_p1  ;;  %s1412_s2 = sld [smem:[#allocation22_spill]] }
  0x1f   : > { %s1113_s26 = smov 512   ;;  %s1114_s27 = smov 32  }
  0x20   : > { %s1413_s3 = sld [smem:[#allocation23_spill]]  ;;  %s1116_s14 = smov [#allocation8]  }
  0x21   : > { %p52_p2 = scmp.ne.s32.totalorder %s1090_s20, %s1086_s19  ;;  %p53_p3 = scmp.eq.s32.totalorder %s1110_s25, 0 }
  0x22   : > { %s169_s9 = sshll.u32 %s1410_s1, 4  ;;  %s1115_s1 = smov [#allocation7]   ;;  %s170_s9 = int_to_ptr.hbm [resolvable:$true] %s169_s9 }
  0x23   : > { %723 = dma.hbm_to_vmem [thread:$0]  (!%p1236_p13), %s170_s9, 8192, %s172_s11, [#allocation6], %s1113_s26, %s1113_s26, %s1114_s27  }
  0x24   : > { %s184_s18 = sshll.u32 %s1412_s2, 4  ;;  %s186_s13 = sshll.u32 %s1115_s1, 4  ;;  %s185_s18 = int_to_ptr.hbm [resolvable:$true] %s184_s18  ;;  %s187_s13 = int_to_ptr.vmem [resolvable:$true] %s186_s13 }
  0x25   : > { %726 = dma.hbm_to_vmem [thread:$0]  (!%p1236_p13), %s185_s18, 64, %s187_s13, [#allocation6]  }
  0x26   : > { %s196_s10 = sshll.u32 %s1413_s3, 4  ;;  %s198_s2 = sshll.u32 %s1116_s14, 4  ;;  %s197_s10 = int_to_ptr.hbm [resolvable:$true] %s196_s10  ;;  %s199_s2 = int_to_ptr.vmem [resolvable:$true] %s198_s2 }
  0x27   : > { %729 = dma.hbm_to_vmem [thread:$0]  (!%p1236_p13), %s197_s10, 64, %s199_s2, [#allocation9]  }
  0x28   : > { %s31_s9 = sadd.s32 1, %s1102_s23  ;;  %s34_s11 = sadd.s32 1, %s1106_s24 }
  0x29   : > { %p32_p0 = scmp.ge.s32.totalorder %s31_s9, 2  ;;  %s681_s1 = sshll.u32 %s1106_s24, 1 }
  0x2a   : > { %s39_s26 = sadd.s32 %s1102_s23, %s681_s1  ;;  %s45_s27 = sadd.s32 1, %s1090_s20 }
  0x2b   : > { %s1435_s9 = smov (%p32_p0, %s31_s9), 0  ;;  %s1437_s11 = smov (!%p32_p0, %s34_s11), %s1106_s24 }
  0x2c   : > { %p36_p5 = scmp.ge.s32.totalorder %s1437_s11, 2  ;;  %s134_s18 = sadd.s32 1, %s1078_s17 }
  0x2d   : > { %p1264_p7 = por %p53_p3, %p52_p2  ;;  %p741_p8 = scmp.lt.s32.totalorder %s1110_s25, 4 }
  0x2e   : > { %s1439_s11 = smov (%p36_p5, %s1437_s11), 0  ;;  %s209_s12 = sand.u32 1, %s1090_s20  }
  0x2f   : > { %s703_s7 = sshll.u32 %s39_s26, 4  ;;  %s682_s8 = sshll.u32 %s1439_s11, 1 }
  0x30   : > { %s131_s10 = ssub.s32 %s1106_s24, %s1439_s11  ;;  %s41_s13 = sadd.s32 %s682_s8, %s1435_s9 }
  0x31   : > { %p132_p9 = scmp.eq.s32.totalorder %s131_s10, 0  ;;  %s42_s14 = ssub.s32 %s39_s26, %s41_s13 }
  0x32   : > { %p43_p12 = scmp.eq.s32.totalorder %s42_s14, 0  ;;  %s688_s1 = sshll.u32 %s209_s12, 4 }
  0x33   : > { %s1277_s3 = scalar_select %p132_p9, %s1078_s17, %s134_s18  }
  0x34   : > { %s1280_s23 = scalar_select %p43_p12, %s1090_s20, %s45_s27  }
  0x35   : > { %s220_s4 = scalar_lea.hbm %s1384_s0, %s703_s7  ;;  %s213_s22 = scalar_lea.vmem [#allocation2], %s688_s1 }
  0x36   : > { %s221_s30 = sshll.u32 %s220_s4, 4  ;;  %s223_s21 = sshll.u32 %s213_s22, 4  ;;  %s222_s30 = int_to_ptr.hbm [resolvable:$true] %s221_s30  ;;  %s224_s21 = int_to_ptr.vmem [resolvable:$true] %s223_s21 }
  0x37   : > { %p731_p13 = pnand %p741_p8, %p1264_p7  ;;  %s210_s8 = scalar_lea.sflag [#allocation3], %s209_s12 }
  0x38   : > { %s1117_s26 = smov 128   ;;  %s1118_s10 = smov 8  }
  0x39   : > { %733 = dma.hbm_to_vmem [thread:$0]  (!%p731_p13), %s222_s30, 256, %s224_s21, %s210_s8, %s1117_s26, %s1117_s26, %s1118_s10  }
  0x3a   : > { %235 = sbr.rel (%p1225_p11) target bundleno = 328 (0x148), region = 36  ;;  %s237_s27 = sand.u32 (!%p1225_p11), 1, %s1086_s19  }
  0x3b   : > { %s1292_s15 = sshll.u32 (!%p1225_p11), %s237_s27, 4  ;;  %s238_s4 = scalar_lea.sflag (!%p1225_p11), [#allocation3], %s237_s27 }
  0x3c   : > { %s241_s22 = scalar_lea.vmem (!%p1225_p11), [#allocation2], %s1292_s15 }
  0x3f   : > { %1053 = dma.done.wait (%p1209_p4), %s238_s4, 256  }
  0x40   : > { %1055 = vsyncadd (%p1209_p4), %s238_s4, 4294967040 }
  0x41   : > { %1057 = dma.done.wait (%p1201_p1), [#allocation6], 8256  }
  0x42   : > { %1059 = vsyncadd (%p1201_p1), [#allocation6], 4294959040 }
  0x43   : > { %1061 = dma.done.wait (%p1201_p1), [#allocation9], 64  }
  0x44   : > { %1063 = vsyncadd (%p1201_p1), [#allocation9], 4294967232  ;;  %s279_s21 = sand.u32 1, %s1074_s16   ;;  %s1415_s29 = sld [smem:[#allocation16_spill]] }
  0x45   : > { %s697_s30 = sshll.u32 %s279_s21, 2 }
  0x46   : > { %s1310_s5 = scalar_lea.vmem [#allocation10], %s697_s30 }
  0x4a   : > { %p698_p4 = scmp.ne.s32.totalorder %s1415_s29, 0 }
  0x4c   : > { %288 = sbr.rel (%p698_p4) target bundleno = 85 (0x55), region = 56 }
  0x51   : > { %v289_v0 = vlaneseq  ;;  %v1119_v1 = vmov 0.0  }
  0x53   : > { %vm291_vm0 = vcmp.lt.s32.totalorder %v289_v0, 512 }
  0x54   : > { %293 = vst.msk [vmem:[%s1310_s5] sm:$0xf] %vm291_vm0, %v1119_v1 }
  0x55 PF: > { %v356_v2 = vld [vmem:[#allocation5 + $0x1e0] sm:$0xff]  ;;  %v357_v3 = vld [vmem:[#allocation5 + $0x1e8] sm:$0xff]  ;;  %v358_v4 = vld [vmem:[#allocation5 + $0x1f0] sm:$0xff]  ;;  %s1416_s28 = sld [smem:[#allocation17_spill]]  ;;  %vm524_vm1 = vcmask 1040384   ;;  %vm526_vm2 = vcmask 1042434  }
  0x56   : > { %370 = vmatpush.msra.mxu0 %v356_v2  ;;  %393 = vmatpush.msra.mxu1 %v357_v3  ;;  %v359_v5 = vld [vmem:[#allocation5 + $0x1f8] sm:$0xff]  ;;  %v352_v6 = vld [vmem:[#allocation5 + $0x1c0] sm:$0xff]  ;;  %v353_v7 = vld [vmem:[#allocation5 + $0x1c8] sm:$0xff]  ;;  %s1417_s6 = sld [smem:[#allocation16_spill]]  ;;  %vm528_vm3 = vcmask 1041408  }
  0x57   : > { %416 = vmatpush.msra.mxu2 %v358_v4  ;;  %439 = vmatpush.msra.mxu3 %v359_v5  ;;  %v354_v8 = vld [vmem:[#allocation5 + $0x1d0] sm:$0xff]  ;;  %v355_v9 = vld [vmem:[#allocation5 + $0x1d8] sm:$0xff]  ;;  %v348_v10 = vld [vmem:[#allocation5 + $0x1a0] sm:$0xff] }
  0x58   : > { %371 = vmatpush.msra.mxu0 %v352_v6  ;;  %394 = vmatpush.msra.mxu1 %v353_v7  ;;  %v349_v11 = vld [vmem:[#allocation5 + $0x1a8] sm:$0xff]  ;;  %v350_v12 = vld [vmem:[#allocation5 + $0x1b0] sm:$0xff]  ;;  %v351_v13 = vld [vmem:[#allocation5 + $0x1b8] sm:$0xff] }
  0x59   : > { %417 = vmatpush.msra.mxu2 %v354_v8  ;;  %440 = vmatpush.msra.mxu3 %v355_v9  ;;  %v344_v14 = vld [vmem:[#allocation5 + $0x180] sm:$0xff]  ;;  %v345_v15 = vld [vmem:[#allocation5 + $0x188] sm:$0xff]  ;;  %v346_v16 = vld [vmem:[#allocation5 + $0x190] sm:$0xff] }
  0x5a   : > { %372 = vmatpush.msra.mxu0 %v348_v10  ;;  %395 = vmatpush.msra.mxu1 %v349_v11  ;;  %v347_v17 = vld [vmem:[#allocation5 + $0x198] sm:$0xff]  ;;  %v340_v18 = vld [vmem:[#allocation5 + $0x160] sm:$0xff]  ;;  %v341_v19 = vld [vmem:[#allocation5 + $0x168] sm:$0xff] }
  0x5b   : > { %418 = vmatpush.msra.mxu2 %v350_v12  ;;  %441 = vmatpush.msra.mxu3 %v351_v13  ;;  %v342_v20 = vld [vmem:[#allocation5 + $0x170] sm:$0xff]  ;;  %v343_v21 = vld [vmem:[#allocation5 + $0x178] sm:$0xff]  ;;  %v336_v22 = vld [vmem:[#allocation5 + $0x140] sm:$0xff]  ;;  %p537_p1 = scmp.eq.s32.totalorder %s1416_s28, 1 }
  0x5c   : > { %373 = vmatpush.msra.mxu0 %v344_v14  ;;  %396 = vmatpush.msra.mxu1 %v345_v15  ;;  %v337_v23 = vld [vmem:[#allocation5 + $0x148] sm:$0xff]  ;;  %v338_v24 = vld [vmem:[#allocation5 + $0x150] sm:$0xff]  ;;  %v339_v25 = vld [vmem:[#allocation5 + $0x158] sm:$0xff]  ;;  %p538_p11 = scmp.eq.s32.totalorder %s1417_s6, 1 }
  0x5d   : > { %419 = vmatpush.msra.mxu2 %v346_v16  ;;  %442 = vmatpush.msra.mxu3 %v347_v17  ;;  %v332_v26 = vld [vmem:[#allocation5 + $0x120] sm:$0xff]  ;;  %v333_v27 = vld [vmem:[#allocation5 + $0x128] sm:$0xff]  ;;  %v334_v28 = vld [vmem:[#allocation5 + $0x130] sm:$0xff] }
  0x5e   : > { %374 = vmatpush.msra.mxu0 %v340_v18  ;;  %397 = vmatpush.msra.mxu1 %v341_v19  ;;  %v335_v29 = vld [vmem:[#allocation5 + $0x138] sm:$0xff]  ;;  %v328_v30 = vld [vmem:[#allocation5 + $0x100] sm:$0xff]  ;;  %v329_v31 = vld [vmem:[#allocation5 + $0x108] sm:$0xff]  ;;  %p1320_p0 = pnand %p538_p11, %p537_p1 }
  0x5f   : > { %420 = vmatpush.msra.mxu2 %v342_v20  ;;  %443 = vmatpush.msra.mxu3 %v343_v21  ;;  %v330_v32 = vld [vmem:[#allocation5 + $0x110] sm:$0xff]  ;;  %v331_v33 = vld [vmem:[#allocation5 + $0x118] sm:$0xff]  ;;  %v324_v34 = vld [vmem:[#allocation5 + $0xe0] sm:$0xff] }
  0x60   : > { %375 = vmatpush.msra.mxu0 %v336_v22  ;;  %398 = vmatpush.msra.mxu1 %v337_v23  ;;  %v325_v35 = vld [vmem:[#allocation5 + $0xe8] sm:$0xff]  ;;  %v326_v36 = vld [vmem:[#allocation5 + $0xf0] sm:$0xff]  ;;  %v327_v37 = vld [vmem:[#allocation5 + $0xf8] sm:$0xff] }
  0x61   : > { %421 = vmatpush.msra.mxu2 %v338_v24  ;;  %444 = vmatpush.msra.mxu3 %v339_v25  ;;  %v320_v38 = vld [vmem:[#allocation5 + $0xc0] sm:$0xff]  ;;  %v321_v39 = vld [vmem:[#allocation5 + $0xc8] sm:$0xff]  ;;  %v322_v40 = vld [vmem:[#allocation5 + $0xd0] sm:$0xff] }
  0x62   : > { %376 = vmatpush.msra.mxu0 %v332_v26  ;;  %399 = vmatpush.msra.mxu1 %v333_v27  ;;  %v323_v41 = vld [vmem:[#allocation5 + $0xd8] sm:$0xff]  ;;  %v316_v42 = vld [vmem:[#allocation5 + $0xa0] sm:$0xff]  ;;  %v317_v43 = vld [vmem:[#allocation5 + $0xa8] sm:$0xff] }
  0x63   : > { %422 = vmatpush.msra.mxu2 %v334_v28  ;;  %445 = vmatpush.msra.mxu3 %v335_v29  ;;  %v318_v44 = vld [vmem:[#allocation5 + $0xb0] sm:$0xff]  ;;  %v319_v45 = vld [vmem:[#allocation5 + $0xb8] sm:$0xff]  ;;  %v312_v46 = vld [vmem:[#allocation5 + $0x80] sm:$0xff] }
  0x64   : > { %377 = vmatpush.msra.mxu0 %v328_v30  ;;  %400 = vmatpush.msra.mxu1 %v329_v31  ;;  %v313_v47 = vld [vmem:[#allocation5 + $0x88] sm:$0xff]  ;;  %v314_v48 = vld [vmem:[#allocation5 + $0x90] sm:$0xff]  ;;  %v315_v49 = vld [vmem:[#allocation5 + $0x98] sm:$0xff] }
  0x65   : > { %423 = vmatpush.msra.mxu2 %v330_v32  ;;  %446 = vmatpush.msra.mxu3 %v331_v33  ;;  %v308_v50 = vld [vmem:[#allocation5 + $0x60] sm:$0xff]  ;;  %v309_v51 = vld [vmem:[#allocation5 + $0x68] sm:$0xff]  ;;  %v310_v52 = vld [vmem:[#allocation5 + $0x70] sm:$0xff] }
  0x66   : > { %378 = vmatpush.msra.mxu0 %v324_v34  ;;  %401 = vmatpush.msra.mxu1 %v325_v35  ;;  %v311_v53 = vld [vmem:[#allocation5 + $0x78] sm:$0xff]  ;;  %v304_v54 = vld [vmem:[#allocation5 + $0x40] sm:$0xff]  ;;  %v305_v55 = vld [vmem:[#allocation5 + $0x48] sm:$0xff] }
  0x67   : > { %424 = vmatpush.msra.mxu2 %v326_v36  ;;  %447 = vmatpush.msra.mxu3 %v327_v37  ;;  %v306_v56 = vld [vmem:[#allocation5 + $0x50] sm:$0xff]  ;;  %v307_v57 = vld [vmem:[#allocation5 + $0x58] sm:$0xff]  ;;  %v300_v58 = vld [vmem:[#allocation5 + $0x20] sm:$0xff] }
  0x68   : > { %379 = vmatpush.msra.mxu0 %v320_v38  ;;  %402 = vmatpush.msra.mxu1 %v321_v39  ;;  %v301_v59 = vld [vmem:[#allocation5 + $0x28] sm:$0xff]  ;;  %v302_v60 = vld [vmem:[#allocation5 + $0x30] sm:$0xff]  ;;  %v303_v61 = vld [vmem:[#allocation5 + $0x38] sm:$0xff] }
  0x69   : > { %425 = vmatpush.msra.mxu2 %v322_v40  ;;  %448 = vmatpush.msra.mxu3 %v323_v41  ;;  %v296_v62 = vld [vmem:[#allocation5] sm:$0xff]  ;;  %v297_v63 = vld [vmem:[#allocation5 + $0x8] sm:$0xff]  ;;  %v298_v0 = vld [vmem:[#allocation5 + $0x10] sm:$0xff] }
  0x6a   : > { %380 = vmatpush.msra.mxu0 %v316_v42  ;;  %403 = vmatpush.msra.mxu1 %v317_v43  ;;  %v299_v1 = vld [vmem:[#allocation5 + $0x18] sm:$0xff]  ;;  %v294_v2 = vld [vmem:[%s241_s22] sm:$0xff] }
  0x6b   : > { %426 = vmatpush.msra.mxu2 %v318_v44  ;;  %449 = vmatpush.msra.mxu3 %v319_v45  ;;  %v295_v3 = vld [vmem:[%s241_s22 + $0x8] sm:$0xff]  ;;  %v360_v4 = vld [vmem:[#allocation7] sm:$0xf]  ;;  %v470_v19 = vld [vmem:[#allocation8] sm:$0xf] }
  0x6c   : > { %381 = vmatpush.msra.mxu0 %v312_v46  ;;  %404 = vmatpush.msra.mxu1 %v313_v47  ;;  %v362_v5 = vperm.slane %v360_v4, 0  ;;  %v363_v8 = vperm.slane %v360_v4, 1  ;;  %v364_v13 = vperm.slane %v360_v4, 2  ;;  %v365_v16 = vperm.slane %v360_v4, 3 }
  0x6d   : > { %427 = vmatpush.msra.mxu2 %v314_v48  ;;  %450 = vmatpush.msra.mxu3 %v315_v49  ;;  %v472_v21 = vperm.slane %v470_v19, 0  ;;  %v473_v26 = vperm.slane %v470_v19, 1  ;;  %v474_v36 = vperm.slane %v470_v19, 2  ;;  %v475_v39 = vperm.slane %v470_v19, 3 }
  0x6e   : > { %382 = vmatpush.msra.mxu0 %v308_v50  ;;  %405 = vmatpush.msra.mxu1 %v309_v51 }
  0x6f   : > { %428 = vmatpush.msra.mxu2 %v310_v52  ;;  %451 = vmatpush.msra.mxu3 %v311_v53 }
  0x70   : > { %383 = vmatpush.msra.mxu0 %v304_v54  ;;  %406 = vmatpush.msra.mxu1 %v305_v55 }
  0x71   : > { %429 = vmatpush.msra.mxu2 %v306_v56  ;;  %452 = vmatpush.msra.mxu3 %v307_v57 }
  0x72   : > { %384 = vmatpush.msra.mxu0 %v300_v58  ;;  %407 = vmatpush.msra.mxu1 %v301_v59 }
  0x73   : > { %430 = vmatpush.msra.mxu2 %v302_v60  ;;  %453 = vmatpush.msra.mxu3 %v303_v61 }
  0x74   : > { %385 = vmatpush.msra.mxu0 %v296_v62  ;;  %408 = vmatpush.msra.mxu1 %v297_v63 }
  0x75   : > { %431 = vmatpush.msra.mxu2 %v298_v0  ;;  %454 = vmatpush.msra.mxu3 %v299_v1 }
  0x76   : > { %386 = vmatmul.f32.vlgmr.msra.gmra.mxu0 %v294_v2  ;;  %409 = vmatmul.f32.vlgmr.msra.gmra.mxu1 %v294_v2 }
  0x77   : > { %432 = vmatmul.f32.vlgmr.msra.gmra.mxu2 %v294_v2  ;;  %455 = vmatmul.f32.vlgmr.msra.gmra.mxu3 %v294_v2 }
  0x7e   : > { %389 = vmatmul.f32.gmra.mxu0 %v295_v3  ;;  %412 = vmatmul.f32.gmra.mxu1 %v295_v3 }
  0x7f   : > { %435 = vmatmul.f32.gmra.mxu2 %v295_v3  ;;  %458 = vmatmul.f32.gmra.mxu3 %v295_v3 }
  0xf3   : > { %v387_v6 = vpop.f32.mrf.mxu0  ;;  %v410_v7 = vpop.f32.mrf.mxu1 }
  0xf4   : > { %v388_v9 = vadd.f32 %v387_v6, %v362_v5  ;;  %v411_v10 = vadd.f32 %v410_v7, %v363_v8 }
  0xf6   : > { %842 = vtanh.f32 %v388_v9 }
  0xf7   : > { %844 = vtanh.f32 %v411_v10 }
  0xfa   : > { %v433_v11 = vpop.f32.mrf.mxu2  ;;  %v456_v12 = vpop.f32.mrf.mxu3 }
  0xfb   : > { %v390_v14 = vpop.f32.mrf.mxu0  ;;  %v413_v15 = vpop.f32.mrf.mxu1  ;;  %v434_v20 = vadd.f32 %v433_v11, %v364_v13  ;;  %v457_v22 = vadd.f32 %v456_v12, %v365_v16  ;;  %v532_v11 = vlaneseq }
  0xfc   : > { %v391_v17 = vadd.f32 %v390_v14, %v362_v5  ;;  %v414_v18 = vadd.f32 %v413_v15, %v363_v8  ;;  %v843_v23 = vpop.eup %842  ;;  %v488_v14 = vld [vmem:[%s1310_s5] sm:$0xf] }
  0xfd   : > { %v845_v29 = vpop.eup %844  ;;  %v480_v30 = vmul.f32 %v843_v23, %v472_v21  ;;  %vm534_vm4 = vcmp.lt.s32.totalorder %v532_v11, 512 }
  0xfe   : > { %846 = vtanh.f32 %v391_v17  ;;  %v481_v34 = vmul.f32 %v845_v29, %v473_v26 }
  0xff   : > { %848 = vtanh.f32 %v414_v18 }
 0x100   : > { %850 = vtanh.f32 %v434_v20 }
 0x101   : > { %852 = vtanh.f32 %v457_v22 }
 0x102   : > { %v436_v24 = vpop.f32.mrf.mxu2  ;;  %v459_v25 = vpop.f32.mrf.mxu3 }
 0x103   : > { %v437_v27 = vadd.f32 %v436_v24, %v364_v13  ;;  %v460_v28 = vadd.f32 %v459_v25, %v365_v16 }
 0x104   : > { %v847_v31 = vpop.eup %846 }
 0x105   : > { %854 = vtanh.f32 %v437_v27  ;;  %v849_v32 = vpop.eup %848  ;;  %v484_v33 = vmul.f32 %v847_v31, %v472_v21 }
 0x106   : > { %856 = vtanh.f32 %v460_v28  ;;  %v485_v35 = vmul.f32 %v849_v32, %v473_v26  ;;  %v851_v38 = vpop.eup %850 }
 0x107   : > { %v489_v37 = vadd.f32 %v484_v33, %v480_v30  ;;  %v853_v41 = vpop.eup %852  ;;  %v482_v46 = vmul.f32 %v851_v38, %v474_v36 }
 0x108   : > { %v496_v40 = vadd.f32 %v485_v35, %v481_v34  ;;  %v483_v48 = vmul.f32 %v853_v41, %v475_v39 }
 0x109   : > { %v490_v42 = vrot.slane %v489_v37, 4 }
 0x10a   : > { %v497_v44 = vrot.slane %v496_v40, 4 }
 0x10b   : > { %v855_v43 = vpop.eup %854  ;;  %v491_v49 = vadd.f32 %v490_v42, %v489_v37 }
 0x10c   : > { %v857_v45 = vpop.eup %856  ;;  %v486_v47 = vmul.f32 %v855_v43, %v474_v36  ;;  %v498_v50 = vadd.f32 %v497_v44, %v496_v40 }
 0x10d   : > { %v487_v51 = vmul.f32 %v857_v45, %v475_v39  ;;  %v492_v56 = vrot.slane %v491_v49, 2 }
 0x10e   : > { %v503_v52 = vadd.f32 %v486_v47, %v482_v46  ;;  %v499_v53 = vrot.slane %v498_v50, 2 }
 0x10f   : > { %v510_v54 = vadd.f32 %v487_v51, %v483_v48  ;;  %v493_v63 = vadd.f32 %v492_v56, %v491_v49 }
 0x110   : > { %v504_v55 = vrot.slane %v503_v52, 4  ;;  %v500_v57 = vadd.f32 %v499_v53, %v498_v50 }
 0x111   : > { %v511_v58 = vrot.slane %v510_v54, 4  ;;  %v494_v5 = vrot.slane %v493_v63, 1 }
 0x112   : > { %v505_v59 = vadd.f32 %v504_v55, %v503_v52  ;;  %v501_v60 = vrot.slane %v500_v57, 1 }
 0x113   : > { %v512_v61 = vadd.f32 %v511_v58, %v510_v54  ;;  %v495_v12 = vadd.f32 %v494_v5, %v493_v63 }
 0x114   : > { %v506_v62 = vrot.slane %v505_v59, 2  ;;  %v502_v2 = vadd.f32 %v501_v60, %v500_v57 }
 0x115   : > { %v513_v0 = vrot.slane %v512_v61, 2 }
 0x116   : > { %v507_v1 = vadd.f32 %v506_v62, %v505_v59  ;;  %v521_v8 = vrot.slane %v502_v2, 7 }
 0x117   : > { %v514_v3 = vadd.f32 %v513_v0, %v512_v61 }
 0x118   : > { %v508_v4 = vrot.slane %v507_v1, 1  ;;  %v525_v15 = vsel %vm524_vm1, %v495_v12, %v521_v8 }
 0x119   : > { %v515_v6 = vrot.slane %v514_v3, 1 }
 0x11a   : > { %v509_v7 = vadd.f32 %v508_v4, %v507_v1 }
 0x11b   : > { %v516_v9 = vadd.f32 %v515_v6, %v514_v3 }
 0x11c   : > { %v522_v10 = vrot.slane %v509_v7, 6 }
 0x11d   : > { %v523_v13 = vrot.slane %v516_v9, 5 }
 0x11f   : > { %v527_v16 = vsel %vm526_vm2, %v522_v10, %v523_v13  ;;  %542 = sbr.rel (%p1320_p0) target bundleno = 307 (0x133), region = 60 }
 0x120   : > { %v529_v17 = vsel %vm528_vm3, %v525_v15, %v527_v16 }
 0x121   : > { %v531_v18 = vadd.f32 %v529_v17, %v488_v14 }
 0x123   : > { %536 = vst.msk [vmem:[%s1310_s5] sm:$0xf] %vm534_vm4, %v531_v18 }
 0x124   : > { %v543_v19 = vld [vmem:[#allocation7] sm:$0xf]  ;;  %v545_v20 = vld [vmem:[#allocation8] sm:$0xf] }
 0x125   : > { %858 = vtanh.f32 %v543_v19 }
 0x12a   : > { %v547_v23 = vld [vmem:[%s1310_s5] sm:$0xf] }
 0x12b   : > { %v859_v21 = vpop.eup %858 }
 0x12c   : > { %v546_v22 = vmul.f32 %v859_v21, %v545_v20 }
 0x12e   : > { %v548_v24 = vmul.f32 14.0, %v546_v22 }
 0x130   : > { %v549_v25 = vsub.f32 %v547_v23, %v548_v24 }
 0x132   : > { %550 = vst.msk [vmem:[%s1310_s5] sm:$0xf] %vm534_vm4, %v549_v25 }
 0x133 PF: > { %s1419_s2 = sld [smem:[#allocation17_spill]]  ;;  %s564_s26 = sshll.u32 %s1310_s5, 4  ;;  %s565_s26 = int_to_ptr.vmem [resolvable:$true] %s564_s26 }
 0x134   : > { %s1421_s1 = sld [smem:[#allocation24_spill]]  ;;  %s552_s27 = scalar_lea.sflag [#allocation4], %s279_s21 }
 0x139   : > { %s700_s7 = sshll.u32 %s1419_s2, 2 }
 0x13a   : > { %s562_s8 = scalar_lea.hbm %s1421_s1, %s700_s7  ;;  %s1000_s29 = scalar_lea.hbm %s1421_s1, 8 }
 0x13b   : > { %s566_s10 = sshll.u32 %s562_s8, 4  ;;  %s567_s10 = int_to_ptr.hbm [resolvable:$true] %s566_s10 }
 0x13c   : > { %s994_s15 = sshra.s32 %s567_s10, 4  ;;  %s995_s15 = int_to_ptr.hbm [resolvable:$true] %s994_s15 }
 0x13d   : > { %s996_s4 = scalar_lea.hbm %s995_s15, 4  ;;  %p1001_p7 = scmp.lt.s32.totalorder %s995_s15, %s1421_s1 }
 0x13e   : > { %p997_p2 = scmp.ne.s32.totalorder %s995_s15, %s996_s4  ;;  %p1002_p8 = scmp.lt.s32.totalorder %s1000_s29, %s996_s4 }
 0x140   : > { %p998_p3 = pnand %p997_p2, %p1215_p6  ;;  %p1003_p9 = por %p1002_p8, %p1001_p7 }
 0x142   : > { %p999_p5 = pneg %p998_p3 }
 0x144   : > { %p1004_p12 = pnand %p1003_p9, %p999_p5 }
 0x146   : > { %1007 = shalt.err (!%p1004_p12)
}
 0x147   : > { %718 = dma.vmem_to_hbm [thread:$0]  (%p1215_p6), %s565_s26, 64, %s567_s10, %s552_s27  }
 0x148 PF: > { %s1422_s21 = sld [smem:[#allocation15_spill]]  ;;  %p745_p13 = scmp.ge.s32.totalorder %s1110_s25, 2 }
 0x14a   : > { %p735_p4 = pnand %p745_p13, %p1221_p10 }
 0x14c   : > { %p736_p1 = pneg %p735_p4 }
 0x14e   : > { %s578_s18 = sand.u32 1, %s1422_s21  }
 0x14f   : > { %s579_s2 = scalar_lea.sflag [#allocation4], %s578_s18 }
 0x150   : > { %1065 = dma.done.wait (%p736_p1), %s579_s2, 64  }
 0x151   : > { %1067 = vsyncadd (%p736_p1), %s579_s2, 4294967232  ;;  %s22_s25 = sadd.s32 1, %s1110_s25   ;;  %s1424_s21 = sld [smem:[#allocation18_spill]] }
 0x152   : > { %p19_p11 = scmp.ge.s32.totalorder %s22_s25, 6   ;;  %s1425_s15 = smov %s1074_s16 }
 0x153   : > { %s1426_s16 = smov %s1078_s17  ;;  %s1427_s17 = smov %s1277_s3 }
 0x154   : > { %s1428_s18 = smov %s1086_s19  ;;  %s1429_s19 = smov %s1090_s20 }
 0x155   : > { %s1430_s20 = smov %s1280_s23  ;;  %s1431_s22 = smov %s1106_s24 }
 0x156   : > { %s1432_s23 = smov %s1435_s9  ;;  %s1433_s24 = smov %s1439_s11 }
 0x157   :  { %21 = sbr.rel (!%p19_p11) target bundleno = 16 (0x10), region = 101 }
 0x15c   :  { %585 = vsyncpa [#allocation3], 1 }
 0x15d   :  { %587 = vsyncpa [#allocation3 + $0x1], 1 }
 0x15e   :  { %588 = vsyncpa [#allocation6], 1 }
 0x15f   :  { %589 = vsyncpa [#allocation9], 1 }
 0x160   :  { %590 = vsyncpa [#allocation4], 1 }
 0x161   :  { %592 = vsyncpa [#allocation4 + $0x1], 1 }

</bundles_post_ra>
